<compile_context>
chip_gen: v5e
topology: v5e:2x2
jax: 0.10.0
libtpu: 0.0.40
codegen_flags: <defaults>
</compile_context>

<pallas_src>
import jax
import jax.numpy as jnp
from jax.experimental import pallas as pl
from jax.experimental.pallas import tpu as pltpu


def simple_self_attention_kernel(x_ref, mask_ref, w_ref, wout_ref, attn_ref):
    # Per-batch-element views (leading batch dim squeezed by BlockSpec):
    #   x: (T, H), mask: (T, 1), w: (1, H), wout: (T, H), attn: (T, 1)
    x = x_ref[...]                                              # (T, H)
    m = mask_ref[...]                                           # (T, 1)
    w = w_ref[...]                                              # (1, H)

    # scores[t] = sum_h x[t, h] * w[h]  — VPU multiply + cross-lane reduce
    # (avoids an MXU matmul with N=1 output).
    scores = jnp.sum(x * w, axis=-1, keepdims=True)             # (T, 1)

    # masked_softmax over the T axis (axis 0 here), matching the torch code:
    #   clamp -> * mask -> exp(x - max) -> * mask -> / (sum + 1e-6)
    s = jnp.clip(scores, -15.0, 15.0) * m
    e = jnp.exp(s - jnp.max(s, axis=0, keepdims=True)) * m
    attn = e / (jnp.sum(e, axis=0, keepdims=True) + 1e-6)       # (T, 1)

    wout_ref[...] = (x * attn).astype(wout_ref.dtype)           # lane-dense (T, H) store
    attn_ref[...] = attn.astype(attn_ref.dtype)


def simple_self_attention(inp, mask, att_weights):
    """inp: (B, T, H), mask: (B, T), att_weights: (H, 1) -> (weighted, attn)."""
    B, T, H = inp.shape
    mask3 = mask.astype(jnp.float32).reshape(B, T, 1)
    w_row = att_weights.astype(jnp.float32).reshape(1, H)       # (H, 1) -> (1, H)

    batched = lambda b: (b, 0, 0)
    shared = lambda b: (0, 0)

    weighted, attn = pl.pallas_call(
        simple_self_attention_kernel,
        out_shape=(
            jax.ShapeDtypeStruct((B, T, H), inp.dtype),
            jax.ShapeDtypeStruct((B, T, 1), jnp.float32),
        ),
        grid=(B,),
        in_specs=[
            pl.BlockSpec((None, T, H), batched),    # input
            pl.BlockSpec((None, T, 1), batched),    # mask
            pl.BlockSpec((1, H), shared),           # attention weight row
        ],
        out_specs=(
            pl.BlockSpec((None, T, H), batched),    # weighted input
            pl.BlockSpec((None, T, 1), batched),    # attention probs
        ),
        compiler_params=pltpu.CompilerParams(dimension_semantics=("parallel",)),
    )(inp, mask3, w_row)

    return weighted, attn[..., 0]


def simple_self_attention_reference(inp, mask, att_weights):
    """Pure-JAX reference mirroring the PyTorch forward."""
    weights = jnp.einsum('bth,ho->bt', inp, att_weights)        # (B, T)
    m = mask.astype(jnp.float32)
    x = jnp.clip(weights, -15.0, 15.0) * m
    e = jnp.exp(x - jnp.max(x, axis=-1, keepdims=True)) * m
    attn = e / (jnp.sum(e, axis=-1, keepdims=True) + 1e-6)
    weighted = inp * attn[..., None]
    return weighted, attn


if __name__ == "__main__":
    B, T, H = 2, 8, 32

    key = jax.random.PRNGKey(0)
    k_inp, k_w = jax.random.split(key, 2)

    inp = jax.random.normal(k_inp, (B, T, H), jnp.float32)

    # mask with some padding positions zeroed out
    mask = (jax.lax.broadcasted_iota(jnp.int32, (B, T), 1)
            < jnp.array([[T], [T - 3]])).astype(jnp.float32)

    # deterministic xavier-uniform-ish attention weights, shape (H, 1)
    bound = (6.0 / (H + 1)) ** 0.5
    att_weights = jax.random.uniform(k_w, (H, 1), jnp.float32,
                                     minval=-bound, maxval=bound)

    weighted, attn = simple_self_attention(inp, mask, att_weights)
    weighted = jax.block_until_ready(weighted)
    attn = jax.block_until_ready(attn)

    ref_weighted, ref_attn = simple_self_attention_reference(inp, mask, att_weights)

    assert weighted.shape == (B, T, H)
    assert attn.shape == (B, T)
    assert jnp.allclose(attn, ref_attn, atol=1e-5, rtol=1e-5), \
        "attention mismatch vs reference"
    assert jnp.allclose(weighted, ref_weighted, atol=1e-5, rtol=1e-5), \
        "weighted output mismatch vs reference"

    print("KERNEL_OK")
</pallas_src>

<mosaic_0001>
module attributes {stable_mosaic.version = 11 : i64} {
  func.func @simple_self_attention_kernel(%arg0: i32, %arg1: memref<1x8x32xf32, #tpu.memory_space<vmem>>, %arg2: memref<1x8x1xf32, #tpu.memory_space<vmem>>, %arg3: memref<1x32xf32, #tpu.memory_space<vmem>>, %arg4: memref<1x8x32xf32, #tpu.memory_space<vmem>>, %arg5: memref<1x8x1xf32, #tpu.memory_space<vmem>>) attributes {dimension_semantics = [#tpu.dimension_semantics<parallel>], iteration_bounds = array<i64: 2>, scalar_prefetch = 0 : i64, scratch_operands = 0 : i64, tpu.core_type = #tpu.core_type<tc>, window_params = [{transform_indices = @transform_0, window_bounds = array<i64: 1, 8, 32>}, {transform_indices = @transform_1, window_bounds = array<i64: 1, 8, 1>}, {pipeline_mode = #tpu.pipeline_mode<synchronous>, transform_indices = @transform_2, window_bounds = array<i64: 1, 32>}, {transform_indices = @transform_3, window_bounds = array<i64: 1, 8, 32>}, {transform_indices = @transform_4, window_bounds = array<i64: 1, 8, 1>}]} {
    %c0 = arith.constant 0 : index
    %c0_0 = arith.constant 0 : index
    %c0_1 = arith.constant 0 : index
    %0 = vector.load %arg1[%c0, %c0_0, %c0_1] : memref<1x8x32xf32, #tpu.memory_space<vmem>>, vector<1x8x32xf32>
    %1 = vector.shape_cast %0 : vector<1x8x32xf32> to vector<8x32xf32>
    %c0_2 = arith.constant 0 : index
    %c0_3 = arith.constant 0 : index
    %c0_4 = arith.constant 0 : index
    %2 = vector.load %arg2[%c0_2, %c0_3, %c0_4] : memref<1x8x1xf32, #tpu.memory_space<vmem>>, vector<1x8x1xf32>
    %3 = vector.shape_cast %2 : vector<1x8x1xf32> to vector<8x1xf32>
    %c0_5 = arith.constant 0 : index
    %c0_6 = arith.constant 0 : index
    %4 = vector.load %arg3[%c0_5, %c0_6] : memref<1x32xf32, #tpu.memory_space<vmem>>, vector<1x32xf32>
    %5 = vector.broadcast %4 : vector<1x32xf32> to vector<8x32xf32>
    %6 = arith.mulf %1, %5 : vector<8x32xf32>
    %cst = arith.constant dense<0.000000e+00> : vector<8xf32>
    %7 = vector.multi_reduction <add>, %6, %cst [1] : vector<8x32xf32> to vector<8xf32>
    %8 = vector.shape_cast %7 : vector<8xf32> to vector<8x1xf32>
    %cst_7 = arith.constant -1.500000e+01 : f32
    %cst_8 = arith.constant 1.500000e+01 : f32
    %9 = vector.broadcast %cst_7 : f32 to vector<8x1xf32>
    %10 = arith.maximumf %9, %8 : vector<8x1xf32>
    %11 = vector.broadcast %cst_8 : f32 to vector<8x1xf32>
    %12 = arith.minimumf %11, %10 : vector<8x1xf32>
    %13 = arith.mulf %12, %3 : vector<8x1xf32>
    %cst_9 = arith.constant dense<0xFF800000> : vector<1xf32>
    %14 = vector.multi_reduction <maximumf>, %13, %cst_9 [0] : vector<8x1xf32> to vector<1xf32>
    %15 = vector.shape_cast %14 : vector<1xf32> to vector<1x1xf32>
    %16 = vector.broadcast %15 : vector<1x1xf32> to vector<8x1xf32>
    %17 = arith.subf %13, %16 : vector<8x1xf32>
    %18 = math.exp %17 : vector<8x1xf32>
    %19 = arith.mulf %18, %3 : vector<8x1xf32>
    %cst_10 = arith.constant dense<0.000000e+00> : vector<1xf32>
    %20 = vector.multi_reduction <add>, %19, %cst_10 [0] : vector<8x1xf32> to vector<1xf32>
    %21 = vector.shape_cast %20 : vector<1xf32> to vector<1x1xf32>
    %cst_11 = arith.constant 9.99999997E-7 : f32
    %22 = vector.broadcast %cst_11 : f32 to vector<1x1xf32>
    %23 = arith.addf %21, %22 : vector<1x1xf32>
    %24 = vector.broadcast %23 : vector<1x1xf32> to vector<8x1xf32>
    %25 = arith.divf %19, %24 : vector<8x1xf32>
    %26 = vector.broadcast %25 : vector<8x1xf32> to vector<8x32xf32>
    %27 = arith.mulf %1, %26 : vector<8x32xf32>
    %c0_12 = arith.constant 0 : index
    %c0_13 = arith.constant 0 : index
    %c0_14 = arith.constant 0 : index
    %28 = vector.load %arg4[%c0_12, %c0_13, %c0_14] : memref<1x8x32xf32, #tpu.memory_space<vmem>>, vector<1x8x32xf32>
    %29 = vector.shape_cast %28 : vector<1x8x32xf32> to vector<8x32xf32>
    %30 = vector.shape_cast %27 : vector<8x32xf32> to vector<1x8x32xf32>
    tpu.vector_store %arg4[%c0_12, %c0_13, %c0_14], %30 {strides = array<i32>} : memref<1x8x32xf32, #tpu.memory_space<vmem>>, vector<1x8x32xf32>,
    %c0_15 = arith.constant 0 : index
    %c0_16 = arith.constant 0 : index
    %c0_17 = arith.constant 0 : index
    %31 = vector.load %arg5[%c0_15, %c0_16, %c0_17] : memref<1x8x1xf32, #tpu.memory_space<vmem>>, vector<1x8x1xf32>
    %32 = vector.shape_cast %31 : vector<1x8x1xf32> to vector<8x1xf32>
    %33 = vector.shape_cast %25 : vector<8x1xf32> to vector<1x8x1xf32>
    tpu.vector_store %arg5[%c0_15, %c0_16, %c0_17], %33 {strides = array<i32>} : memref<1x8x1xf32, #tpu.memory_space<vmem>>, vector<1x8x1xf32>,
    return
  }
  func.func @transform_0(%arg0: i32) -> (i32, i32, i32) {
    %c0_i32 = arith.constant 0 : i32
    %c0_i32_0 = arith.constant 0 : i32
    %c0_i32_1 = arith.constant 0 : i32
    return %arg0, %c0_i32, %c0_i32_0 : i32, i32, i32
  }
  func.func @transform_1(%arg0: i32) -> (i32, i32, i32) {
    %c0_i32 = arith.constant 0 : i32
    %c0_i32_0 = arith.constant 0 : i32
    %c0_i32_1 = arith.constant 0 : i32
    return %arg0, %c0_i32, %c0_i32_0 : i32, i32, i32
  }
  func.func @transform_2(%arg0: i32) -> (i32, i32) {
    %c0_i32 = arith.constant 0 : i32
    %c0_i32_0 = arith.constant 0 : i32
    %c0_i32_1 = arith.constant 0 : i32
    return %c0_i32, %c0_i32_0 : i32, i32
  }
  func.func @transform_3(%arg0: i32) -> (i32, i32, i32) {
    %c0_i32 = arith.constant 0 : i32
    %c0_i32_0 = arith.constant 0 : i32
    %c0_i32_1 = arith.constant 0 : i32
    return %arg0, %c0_i32, %c0_i32_0 : i32, i32, i32
  }
  func.func @transform_4(%arg0: i32) -> (i32, i32, i32) {
    %c0_i32 = arith.constant 0 : i32
    %c0_i32_0 = arith.constant 0 : i32
    %c0_i32_1 = arith.constant 0 : i32
    return %arg0, %c0_i32, %c0_i32_0 : i32, i32, i32
  }
}

</mosaic_0001>

<bundles_post_ra>
// kernel: tpu_custom_call.1
= control target key start
LH: loop header
LB: loop body
LE: loop exit
PB: predicated region body
PF: predicated region fallthrough
CT: control target
= control target key end

     0   :  { %10 = vsyncpa [#allocation3], 0  ;;  %s649_s0 = inlined_call_operand.vmem [shape: f32[2,8,32], index: 0, kind: input, shape index: {}]   ;;  %s650_s1 = inlined_call_operand.vmem [shape: f32[2,8,1], index: 1, kind: input, shape index: {}]   ;;  %s651_s2 = inlined_call_operand.vmem [shape: f32[1,32], index: 2, kind: input, shape index: {}]   ;;  %s652_s3 = inlined_call_operand.hbm [shape: f32[2,8,32], index: 3, kind: output, shape index: {0}]   ;;  %s653_s4 = inlined_call_operand.vmem [shape: f32[2,8,1], index: 4, kind: output, shape index: {1}]  }
   0x1   :  { %12 = vsyncpa [#allocation3 + $0x1], 0  ;;  %s545_s15 = smov 0   ;;  %s547_s16 = smov 0  }
   0x2   :  { %s549_s17 = smov 0   ;;  %s551_s18 = smov 0  }
   0x3 LB: > { %s566_s19 = sadd.s32 4294967295, %s517_s18   ;;  %s396_s20 = sadd.s32 4294967294, %s517_s18   ;;  %s517_s18 = sphi %s551_s18, %s659_s18   ;;  %s513_s17 = sphi %s549_s17, %s658_s17   ;;  %s509_s16 = sphi %s547_s16, %s657_s16   ;;  %s505_s15 = sphi %s545_s15, %s656_s15  }
   0x4   : > { %s570_s21 = sadd.s32 1, %s517_s18   ;;  %s98_s22 = sadd.s32 1, %s513_s17 }
   0x5   : > { %s95_s23 = ssub.s32 %s517_s18, %s570_s21  ;;  %p108_p0 = scmp.ne.s32.totalorder %s513_s17, %s509_s16 }
   0x6   : > { %p96_p1 = scmp.eq.s32.totalorder %s95_s23, 0  ;;  %p109_p2 = scmp.eq.s32.totalorder %s566_s19, 1 }
   0x7   : > { %p114_p3 = scmp.ne.s32.totalorder %s509_s16, %s505_s15  ;;  %p115_p4 = scmp.eq.s32.totalorder %s396_s20, 1 }
   0x8   : > { %s581_s24 = scalar_select %p96_p1, %s513_s17, %s98_s22  }
   0x9   : > { %p583_p5 = por %p109_p2, %p108_p0  ;;  %p587_p6 = por %p115_p4, %p114_p3 }
   0xa   : > { %p399_p7 = scmp.ge.s32.totalorder %s517_s18, 1  ;;  %p176_p8 = scmp.lt.s32.totalorder %s517_s18, 3 }
   0xc   : > { %p177_p9 = pnand %p399_p7, %p176_p8 }
   0xd   : > { %p209_p10 = scmp.lt.s32.totalorder (!%p177_p9), %s566_s19, 1  ;;  %s200_s14 = sand.u32 (!%p177_p9), 1, %s509_s16  }
   0xe   : > { %180 = sbr.rel (%p177_p9) target bundleno = 327 (0x147), region = 32  ;;  %s400_s20 = sshll.u32 (!%p177_p9), %s200_s14, 3 }
   0xf   : > { %s406_s22 = sshll.u32 (!%p177_p9), %s566_s19, 3  ;;  %s202_s29 = scalar_lea.vmem (!%p177_p9), [#allocation2], %s400_s20 }
  0x10   : > { %s293_s28 = scalar_lea.hbm (!%p177_p9), %s652_s3, %s406_s22  ;;  %s295_s5 = sshll.u32 (!%p177_p9), %s202_s29, 4  ;;  %s296_s5 = int_to_ptr.vmem [resolvable:$true] %s295_s5 }
  0x11   : > { %s297_s6 = sshll.u32 (!%p177_p9), %s293_s28, 4  ;;  %s298_s6 = int_to_ptr.hbm [resolvable:$true] %s297_s6 }
  0x13   : > { %s210_s27 = scalar_select %p209_p10, %s566_s19, 1  ;;  %v450_v0 = vld [vmem:[%s651_s2] ss:$0 sm:$0xff]  ;;  %vm228_vm0 = vcmask 261120   ;;  %vm235_vm1 = vcmask 7168   ;;  %v519_v14 = vmov 0  }
  0x14   : > { %449 = vset.pattern.permute.xlu0 %v519_v14 }
  0x15   : > { %s598_s30 = sshll.u32 %s210_s27, 3 }
  0x16   : > { %s212_s7 = scalar_lea.vmem %s649_s0, %s598_s30  ;;  %s216_s10 = scalar_lea.vmem %s650_s1, %s598_s30 }
  0x17   : > { %v221_v1 = vld [vmem:[%s212_s7] sm:$0xff]  ;;  %s220_s13 = scalar_lea.vmem %s653_s4, %s598_s30  ;;  %s279_s30 = scalar_lea.sflag [#allocation3], %s200_s14 }
  0x18   : > { %v227_v2 = vmul.f32 %v450_v0, %v221_v1  ;;  %v222_v4 = vld [vmem:[%s216_s10] sm:$0xff]  ;;  %s469_s7 = sshra.s32 %s298_s6, 4  ;;  %s475_s10 = scalar_lea.hbm %s652_s3, 16  ;;  %s470_s7 = int_to_ptr.hbm [resolvable:$true] %s469_s7 }
  0x19   : > { %s471_s8 = scalar_lea.hbm %s470_s7, 8  ;;  %p476_p0 = scmp.lt.s32.totalorder %s470_s7, %s652_s3 }
  0x1a   : > { %v229_v3 = vsel %vm228_vm0, %v227_v2, 0.0  ;;  %p472_p11 = scmp.ne.s32.totalorder %s470_s7, %s471_s8  ;;  %p477_p1 = scmp.lt.s32.totalorder %s475_s10, %s471_s8 }
  0x1b   : > { %230 = vadd.xlane.f32.xlu0 %v229_v3 }
  0x1c   : > { %p473_p12 = pnand %p472_p11, %p583_p5  ;;  %p478_p2 = por %p477_p1, %p476_p0 }
  0x1e   : > { %p474_p13 = pneg %p473_p12 }
  0x20   : > { %p479_p3 = pnand %p478_p2, %p474_p13 }
  0x8e   : > { %v231_v5 = vpop.xlane.xlu0 %230 }
  0x8f   : > { %v404_v6 = vclamps-f32 %v231_v5, 15.0 }
  0x91   : > { %v234_v7 = vmul.f32 %v404_v6, %v222_v4 }
  0x93   : > { %v236_v8 = vsel %vm235_vm1, %v234_v7, -inf }
  0x94   : > { %v237_v9 = vrot.slane %v236_v8, 4 }
  0x96   : > { %v238_v10 = vmax.f32 %v236_v8, %v237_v9 }
  0x98   : > { %v239_v11 = vrot.slane %v238_v10, 2 }
  0x9a   : > { %v240_v12 = vmax.f32 %v238_v10, %v239_v11 }
  0x9c   : > { %v241_v13 = vrot.slane %v240_v12, 1 }
  0x9e   : > { %v242_v15 = vmax.f32 %v240_v12, %v241_v13 }
  0xa0   : > { %v243_v16 = vsub.f32 %v234_v7, %v242_v15 }
  0xa2   : > { %v244_v17 = vmul.f32 1.442695, %v243_v16 }
  0xa4   : > { %451 = vpow2.f32 %v244_v17 }
  0xaa   : > { %v452_v18 = vpop.eup %451 }
  0xab   : > { %v246_v19 = vmul.f32 %v452_v18, %v222_v4 }
  0xad   : > { %v247_v20 = vsel %vm235_vm1, %v246_v19, 0.0 }
  0xae   : > { %v248_v21 = vrot.slane %v247_v20, 4 }
  0xb0   : > { %v249_v22 = vadd.f32 %v248_v21, %v247_v20 }
  0xb2   : > { %v250_v23 = vrot.slane %v249_v22, 2 }
  0xb4   : > { %v251_v24 = vadd.f32 %v250_v23, %v249_v22 }
  0xb6   : > { %v252_v25 = vrot.slane %v251_v24, 1 }
  0xb8   : > { %v253_v26 = vadd.f32 %v252_v25, %v251_v24 }
  0xba   : > { %v254_v27 = vadd.f32 1e-06, %v253_v26 }
  0xbc   : > { %453 = vrcp.f32 %v254_v27  ;;  %v266_v31 = vand.u32 2147483648, %v254_v27  ;;  %v264_v33 = vand.u32 2147483647, %v254_v27  ;;  %vm260_vm3 = vweird.f32 %v254_v27 }
  0xbe   : > { %v267_v35 = vor.u32 1.1754944e-38, %v266_v31  ;;  %vm265_vm5 = vcmp.eq.f32.partialorder %v264_v33, 8.507059e+37 }
  0xc2   : > { %v454_v28 = vpop.eup %453 }
  0xc3   : > { %v256_v29 = vmul.f32 %v454_v28, %v254_v27  ;;  %vm261_vm2 = vweird.f32 %v454_v28 }
  0xc4   : > { %vm262_vm4 = vmor %vm260_vm3, %vm261_vm2 }
  0xc5   : > { %v257_v30 = vsub.f32 1.0, %v256_v29 }
  0xc7   : > { %v258_v32 = vmul.f32 %v454_v28, %v257_v30 }
  0xc9   : > { %v259_v34 = vadd.f32 %v454_v28, %v258_v32 }
  0xcb   : > { %v263_v36 = vsel %vm262_vm4, %v454_v28, %v259_v34 }
  0xcc   : > { %v268_v37 = vsel %vm265_vm5, %v267_v35, %v263_v36 }
  0xcd   : > { %v269_v38 = vmul.f32 %v268_v37, %v246_v19 }
  0xcf   : > { %272 = vperm.xlu0 %449, %v269_v38   ;;  %277 = vst.msk [vmem:[%s220_s13] sm:$0xff] %vm235_vm1, %v269_v38 }
 0x141   : > { %v273_v39 = vpop.permute.xlu0 %272 }
 0x142   : > { %v275_v40 = vmul.f32 %v273_v39, %v221_v1 }
 0x144   : > { %276 = vst.msk [vmem:[%s202_s29] sm:$0xff] %vm228_vm0, %v275_v40 }
 0x145   : > { %482 = shalt.err (!%p479_p3)
}
 0x146   : > { %409 = dma.vmem_to_hbm [thread:$0]  (%p583_p5), %s296_s5, 128, %s298_s6, %s279_s30  }
 0x147 PF: > { %p415_p4 = scmp.ge.s32.totalorder %s517_s18, 2  ;;  %s312_s13 = sand.u32 1, %s505_s15  }
 0x148   : > { %s313_s14 = scalar_lea.sflag [#allocation3], %s312_s13 }
 0x149   : > { %p412_p7 = pnand %p415_p4, %p587_p6 }
 0x14b   : > { %p413_p8 = pneg %p412_p7 }
 0x14d   : > { %500 = dma.done.wait (%p413_p8), %s313_s14, 128  }
 0x14e   : > { %502 = vsyncadd (%p413_p8), %s313_s14, 4294967168  ;;  %p15_p9 = scmp.ge.s32.totalorder %s570_s21, 4   ;;  %s656_s15 = smov %s509_s16 }
 0x14f   : > { %s657_s16 = smov %s513_s17  ;;  %s658_s17 = smov %s581_s24 }
 0x150   : > { %s659_s18 = smov %s570_s21  ;;  %17 = sbr.rel (!%p15_p9) target bundleno = 3 (0x3), region = 82 }
 0x155   :  { %326 = vsyncpa [#allocation3], 1 }
 0x156   :  { %328 = vsyncpa [#allocation3 + $0x1], 1 }

</bundles_post_ra>
